<compile_context>
chip_gen: v6e
topology: v6e:2x2x1
jax: 0.10.0
libtpu: 0.0.40
codegen_flags: <defaults>
</compile_context>

<pallas_src>
import jax
import jax.numpy as jnp
from jax.experimental import pallas as pl
from jax.experimental.pallas import tpu as pltpu

H1, H2, H3 = 512, 256, 128          # fc1/fc2/fc3 widths
_B4_OFF = H1 + H2 + H3              # = 896; b4 occupies lanes 896:1024
_BIAS_LANES = _B4_OFF + 128         # = 1024


def _cdiv(a, b):
    return -(-a // b)


def _round_up(a, m):
    return _cdiv(a, m) * m


def qnetwork_kernel(s_ref, a_ref, w1s_ref, w1a_ref, w2_ref, w3_ref, w4_ref,
                    bias_ref, o_ref):
    f32, bf16 = jnp.float32, jnp.bfloat16

    # Packed biases: lane-aligned static slices of the single (1, 1024) buffer.
    b1 = bias_ref[:, 0:H1]
    b2 = bias_ref[:, H1:H1 + H2]
    b3 = bias_ref[:, H1 + H2:_B4_OFF]
    b4 = bias_ref[:, _B4_OFF:_BIAS_LANES]      # fc4 bias replicated over lanes

    # fc1 + relu, concat fused: cat([s, a]) @ W1 == s @ W1s + a @ W1a.
    # bf16 x bf16 MXU dots with f32 accumulation; elementwise stays f32.
    h = jnp.dot(s_ref[...], w1s_ref[...], preferred_element_type=f32)
    h = h + jnp.dot(a_ref[...], w1a_ref[...], preferred_element_type=f32)
    h = jnp.maximum(h + b1, 0.0)
    # fc2 + relu
    h = jnp.dot(h.astype(bf16), w2_ref[...], preferred_element_type=f32)
    h = jnp.maximum(h + b2, 0.0)
    # fc3 + relu
    h = jnp.dot(h.astype(bf16), w3_ref[...], preferred_element_type=f32)
    h = jnp.maximum(h + b3, 0.0)
    # fc4 on the VPU/XLU (avoids a wasted N=1 MXU pass): (tb,128)*(1,128),
    # lane-reduce -> (tb, 1).  Kept in f32 (v5e elementwise fast path).
    q = jnp.sum(h * w4_ref[...].astype(f32), axis=-1, keepdims=True)

    out_lanes = o_ref.shape[1]        # static block shape
    if out_lanes == 1:
        # Large-batch path: 4 B/row of HBM write traffic.
        o_ref[...] = (q + b4[:, :1]).astype(o_ref.dtype)
    else:
        # Tiny single-program path: lane-dense broadcast slab (unmasked vst);
        # the wrapper slices column 0.
        o_ref[...] = (jnp.broadcast_to(q, (q.shape[0], out_lanes))
                      + b4).astype(o_ref.dtype)


def qnetwork_forward(state, action, params, *, block_b=1024):
    """state: (B, num_inputs), action: (B, num_actions) -> (B, 1) float32."""
    w1s, w1a = params["w1s"], params["w1a"]
    w2, w3, w4 = params["w2"], params["w3"], params["w4"]
    bias = params["bias"]

    B, ni = state.shape
    na = action.shape[1]
    state = state.astype(jnp.bfloat16)
    action = action.astype(jnp.bfloat16)

    SMALL_B = 256   # below this, a single program + 128-wide slab output
    MAX_TB = 2048   # keep per-block intermediates well inside v7x VMEM

    if B <= SMALL_B:
        n_blocks, tb, out_lanes = 1, B, 128
    else:
        bb = max(8, min(block_b, MAX_TB))
        n_blocks = 2 * _cdiv(B, 2 * bb)          # even and >= 2 (both v7x TCs)
        tb = _round_up(_cdiv(B, n_blocks), 8)
        out_lanes = 1
    Bp = n_blocks * tb
    if Bp != B:
        state = jnp.pad(state, ((0, Bp - B), (0, 0)))
        action = jnp.pad(action, ((0, Bp - B), (0, 0)))

    def _resident(arr):
        # Full-array block, same block every grid step -> stays in VMEM.
        return pl.BlockSpec(arr.shape, lambda i: (0, 0))

    def _nbytes(a):
        return int(a.size) * a.dtype.itemsize

    flops = 2 * Bp * ((ni + na) * H1 + H1 * H2 + H2 * H3 + H3)
    bytes_accessed = (_nbytes(state) + _nbytes(action)
                      + sum(_nbytes(t) for t in (w1s, w1a, w2, w3, w4, bias))
                      + Bp * out_lanes * 4)

    out = pl.pallas_call(
        qnetwork_kernel,
        out_shape=jax.ShapeDtypeStruct((Bp, out_lanes), jnp.float32),
        grid_spec=pltpu.PrefetchScalarGridSpec(
            num_scalar_prefetch=0,
            grid=(n_blocks,),
            in_specs=[
                pl.BlockSpec((tb, ni), lambda i: (i, 0)),   # state
                pl.BlockSpec((tb, na), lambda i: (i, 0)),   # action
                _resident(w1s), _resident(w1a),
                _resident(w2), _resident(w3), _resident(w4),
                _resident(bias),
            ],
            out_specs=pl.BlockSpec((tb, out_lanes), lambda i: (i, 0)),
        ),
        compiler_params=pltpu.CompilerParams(
            dimension_semantics=("parallel",)),
        cost_estimate=pl.CostEstimate(
            flops=flops, transcendentals=0, bytes_accessed=bytes_accessed),
    )(state, action, w1s, w1a, w2, w3, w4, bias)

    if out_lanes == 1:
        return out[:B]
    return out[:B, :1]


def qnetwork_reference(state, action, params):
    """Pure-JAX reference matching the kernel's numerics (bf16 dot inputs,
    f32 accumulation / elementwise)."""
    f32, bf16 = jnp.float32, jnp.bfloat16
    bias = params["bias"]
    b1 = bias[:, 0:H1]
    b2 = bias[:, H1:H1 + H2]
    b3 = bias[:, H1 + H2:_B4_OFF]
    b4 = bias[:, _B4_OFF:_B4_OFF + 1]

    s = state.astype(bf16)
    a = action.astype(bf16)
    h = (jnp.dot(s, params["w1s"], preferred_element_type=f32)
         + jnp.dot(a, params["w1a"], preferred_element_type=f32))
    h = jnp.maximum(h + b1, 0.0)
    h = jnp.maximum(jnp.dot(h.astype(bf16), params["w2"],
                            preferred_element_type=f32) + b2, 0.0)
    h = jnp.maximum(jnp.dot(h.astype(bf16), params["w3"],
                            preferred_element_type=f32) + b3, 0.0)
    return jnp.sum(h * params["w4"].astype(f32), axis=-1, keepdims=True) + b4


def init_params(key, num_inputs, num_actions):
    """Deterministic init mimicking torch.nn.Linear defaults
    (uniform(-1/sqrt(fan_in), 1/sqrt(fan_in))).  Weights stored (in, out) in
    bf16; all biases packed into a single (1, 1024) f32 buffer."""
    ni, na = num_inputs, num_actions

    def linear(k, fan_in, fan_out):
        kw, kb = jax.random.split(k)
        bound = 1.0 / (float(fan_in) ** 0.5)
        w = jax.random.uniform(kw, (fan_in, fan_out), jnp.float32, -bound, bound)
        b = jax.random.uniform(kb, (1, fan_out), jnp.float32, -bound, bound)
        return w, b

    k1, k2, k3, k4 = jax.random.split(key, 4)
    w1, b1 = linear(k1, ni + na, H1)
    w2, b2 = linear(k2, H1, H2)
    w3, b3 = linear(k3, H2, H3)
    w4, b4 = linear(k4, H3, 1)

    bf16 = jnp.bfloat16
    bias = jnp.concatenate(
        [b1, b2, b3, jnp.broadcast_to(b4, (1, 128))], axis=1)   # (1, 1024) f32
    return {
        "w1s": w1[:ni].astype(bf16),     # fc1 split for the fused concat
        "w1a": w1[ni:].astype(bf16),
        "w2": w2.astype(bf16),
        "w3": w3.astype(bf16),
        "w4": w4.T.astype(bf16),         # (1, 128) row
        "bias": bias,
    }


if __name__ == "__main__":
    num_inputs = 24
    num_actions = 8

    key = jax.random.PRNGKey(0)
    key, kp = jax.random.split(key)
    params = init_params(kp, num_inputs, num_actions)

    # Exercise both the single-program (slab output) and multi-block
    # (packed (B,1) output, even block count) paths.
    for batch in (8, 384):
        ks, ka = jax.random.split(jax.random.fold_in(key, batch))
        state = jax.random.normal(ks, (batch, num_inputs), jnp.float32)
        action = jax.random.normal(ka, (batch, num_actions), jnp.float32)

        q = qnetwork_forward(state, action, params)
        jax.block_until_ready(q)

        ref = qnetwork_reference(state, action, params)
        assert q.shape == (batch, 1)
        err = float(jnp.max(jnp.abs(q - ref)))
        assert jnp.allclose(q, ref, atol=2e-3, rtol=2e-3), (batch, err)

    print("KERNEL_OK")
</pallas_src>

<mosaic_0001>
module attributes {stable_mosaic.version = 11 : i64} {
  func.func @qnetwork_kernel(%arg0: i32, %arg1: memref<8x24xbf16, #tpu.memory_space<vmem>>, %arg2: memref<8x8xbf16, #tpu.memory_space<vmem>>, %arg3: memref<24x512xbf16, #tpu.memory_space<vmem>>, %arg4: memref<8x512xbf16, #tpu.memory_space<vmem>>, %arg5: memref<512x256xbf16, #tpu.memory_space<vmem>>, %arg6: memref<256x128xbf16, #tpu.memory_space<vmem>>, %arg7: memref<1x128xbf16, #tpu.memory_space<vmem>>, %arg8: memref<1x1024xf32, #tpu.memory_space<vmem>>, %arg9: memref<8x128xf32, #tpu.memory_space<vmem>>) attributes {dimension_semantics = [#tpu.dimension_semantics<parallel>], iteration_bounds = array<i64: 1>, scalar_prefetch = 0 : i64, scratch_operands = 0 : i64, tpu.core_type = #tpu.core_type<tc>, window_params = [{transform_indices = @transform_0, window_bounds = array<i64: 8, 24>}, {transform_indices = @transform_1, window_bounds = array<i64: 8, 8>}, {pipeline_mode = #tpu.pipeline_mode<synchronous>, transform_indices = @transform_2, window_bounds = array<i64: 24, 512>}, {pipeline_mode = #tpu.pipeline_mode<synchronous>, transform_indices = @transform_3, window_bounds = array<i64: 8, 512>}, {pipeline_mode = #tpu.pipeline_mode<synchronous>, transform_indices = @transform_4, window_bounds = array<i64: 512, 256>}, {pipeline_mode = #tpu.pipeline_mode<synchronous>, transform_indices = @transform_5, window_bounds = array<i64: 256, 128>}, {pipeline_mode = #tpu.pipeline_mode<synchronous>, transform_indices = @transform_6, window_bounds = array<i64: 1, 128>}, {pipeline_mode = #tpu.pipeline_mode<synchronous>, transform_indices = @transform_7, window_bounds = array<i64: 1, 1024>}, {transform_indices = @transform_8, window_bounds = array<i64: 8, 128>}]} {
    %c0 = arith.constant 0 : index
    %c0_0 = arith.constant 0 : index
    %0 = vector.load %arg8[%c0, %c0_0] : memref<1x1024xf32, #tpu.memory_space<vmem>>, vector<1x512xf32>
    %c0_1 = arith.constant 0 : index
    %c512 = arith.constant 512 : index
    %1 = vector.load %arg8[%c0_1, %c512] : memref<1x1024xf32, #tpu.memory_space<vmem>>, vector<1x256xf32>
    %c0_2 = arith.constant 0 : index
    %c768 = arith.constant 768 : index
    %2 = vector.load %arg8[%c0_2, %c768] : memref<1x1024xf32, #tpu.memory_space<vmem>>, vector<1x128xf32>
    %c0_3 = arith.constant 0 : index
    %c896 = arith.constant 896 : index
    %3 = vector.load %arg8[%c0_3, %c896] : memref<1x1024xf32, #tpu.memory_space<vmem>>, vector<1x128xf32>
    %c0_4 = arith.constant 0 : index
    %c0_5 = arith.constant 0 : index
    %4 = vector.load %arg1[%c0_4, %c0_5] : memref<8x24xbf16, #tpu.memory_space<vmem>>, vector<8x24xbf16>
    %c0_6 = arith.constant 0 : index
    %c0_7 = arith.constant 0 : index
    %5 = vector.load %arg3[%c0_6, %c0_7] : memref<24x512xbf16, #tpu.memory_space<vmem>>, vector<24x512xbf16>
    %cst = arith.constant dense<0.000000e+00> : vector<8x512xf32>
    %6 = tpu.matmul %4, %5, %cst {dimension_numbers = #tpu.dot_dimension_numbers<[1], [0], [0], [1], [0, 0, 1, 1], [], []>} : vector<8x24xbf16>, vector<24x512xbf16>, vector<8x512xf32> -> vector<8x512xf32>
    %c0_8 = arith.constant 0 : index
    %c0_9 = arith.constant 0 : index
    %7 = vector.load %arg2[%c0_8, %c0_9] : memref<8x8xbf16, #tpu.memory_space<vmem>>, vector<8x8xbf16>
    %c0_10 = arith.constant 0 : index
    %c0_11 = arith.constant 0 : index
    %8 = vector.load %arg4[%c0_10, %c0_11] : memref<8x512xbf16, #tpu.memory_space<vmem>>, vector<8x512xbf16>
    %cst_12 = arith.constant dense<0.000000e+00> : vector<8x512xf32>
    %9 = tpu.matmul %7, %8, %cst_12 {dimension_numbers = #tpu.dot_dimension_numbers<[1], [0], [0], [1], [0, 0, 1, 1], [], []>} : vector<8x8xbf16>, vector<8x512xbf16>, vector<8x512xf32> -> vector<8x512xf32>
    %10 = arith.addf %6, %9 : vector<8x512xf32>
    %11 = vector.broadcast %0 : vector<1x512xf32> to vector<8x512xf32>
    %12 = arith.addf %10, %11 : vector<8x512xf32>
    %cst_13 = arith.constant 0.000000e+00 : f32
    %13 = vector.broadcast %cst_13 : f32 to vector<8x512xf32>
    %14 = arith.maximumf %12, %13 : vector<8x512xf32>
    %15 = arith.truncf %14 : vector<8x512xf32> to vector<8x512xbf16>
    %c0_14 = arith.constant 0 : index
    %c0_15 = arith.constant 0 : index
    %16 = vector.load %arg5[%c0_14, %c0_15] : memref<512x256xbf16, #tpu.memory_space<vmem>>, vector<512x256xbf16>
    %cst_16 = arith.constant dense<0.000000e+00> : vector<8x256xf32>
    %17 = tpu.matmul %15, %16, %cst_16 {dimension_numbers = #tpu.dot_dimension_numbers<[1], [0], [0], [1], [0, 0, 1, 1], [], []>} : vector<8x512xbf16>, vector<512x256xbf16>, vector<8x256xf32> -> vector<8x256xf32>
    %18 = vector.broadcast %1 : vector<1x256xf32> to vector<8x256xf32>
    %19 = arith.addf %17, %18 : vector<8x256xf32>
    %cst_17 = arith.constant 0.000000e+00 : f32
    %20 = vector.broadcast %cst_17 : f32 to vector<8x256xf32>
    %21 = arith.maximumf %19, %20 : vector<8x256xf32>
    %22 = arith.truncf %21 : vector<8x256xf32> to vector<8x256xbf16>
    %c0_18 = arith.constant 0 : index
    %c0_19 = arith.constant 0 : index
    %23 = vector.load %arg6[%c0_18, %c0_19] : memref<256x128xbf16, #tpu.memory_space<vmem>>, vector<256x128xbf16>
    %cst_20 = arith.constant dense<0.000000e+00> : vector<8x128xf32>
    %24 = tpu.matmul %22, %23, %cst_20 {dimension_numbers = #tpu.dot_dimension_numbers<[1], [0], [0], [1], [0, 0, 1, 1], [], []>} : vector<8x256xbf16>, vector<256x128xbf16>, vector<8x128xf32> -> vector<8x128xf32>
    %25 = vector.broadcast %2 : vector<1x128xf32> to vector<8x128xf32>
    %26 = arith.addf %24, %25 : vector<8x128xf32>
    %cst_21 = arith.constant 0.000000e+00 : f32
    %27 = vector.broadcast %cst_21 : f32 to vector<8x128xf32>
    %28 = arith.maximumf %26, %27 : vector<8x128xf32>
    %c0_22 = arith.constant 0 : index
    %c0_23 = arith.constant 0 : index
    %29 = vector.load %arg7[%c0_22, %c0_23] : memref<1x128xbf16, #tpu.memory_space<vmem>>, vector<1x128xbf16>
    %30 = arith.extf %29 : vector<1x128xbf16> to vector<1x128xf32>
    %31 = vector.broadcast %30 : vector<1x128xf32> to vector<8x128xf32>
    %32 = arith.mulf %28, %31 : vector<8x128xf32>
    %cst_24 = arith.constant dense<0.000000e+00> : vector<8xf32>
    %33 = vector.multi_reduction <add>, %32, %cst_24 [1] : vector<8x128xf32> to vector<8xf32>
    %34 = vector.shape_cast %33 : vector<8xf32> to vector<8x1xf32>
    %35 = vector.shape_cast %34 : vector<8x1xf32> to vector<8x1xf32>
    %36 = vector.broadcast %35 : vector<8x1xf32> to vector<8x128xf32>
    %37 = vector.broadcast %3 : vector<1x128xf32> to vector<8x128xf32>
    %38 = arith.addf %36, %37 : vector<8x128xf32>
    %c0_25 = arith.constant 0 : index
    %c0_26 = arith.constant 0 : index
    %39 = vector.load %arg9[%c0_25, %c0_26] : memref<8x128xf32, #tpu.memory_space<vmem>>, vector<8x128xf32>
    tpu.vector_store %arg9[%c0_25, %c0_26], %38 {strides = array<i32>} : memref<8x128xf32, #tpu.memory_space<vmem>>, vector<8x128xf32>,
    return
  }
  func.func @transform_0(%arg0: i32) -> (i32, i32) {
    %c0_i32 = arith.constant 0 : i32
    %c0_i32_0 = arith.constant 0 : i32
    return %arg0, %c0_i32 : i32, i32
  }
  func.func @transform_1(%arg0: i32) -> (i32, i32) {
    %c0_i32 = arith.constant 0 : i32
    %c0_i32_0 = arith.constant 0 : i32
    return %arg0, %c0_i32 : i32, i32
  }
  func.func @transform_2(%arg0: i32) -> (i32, i32) {
    %c0_i32 = arith.constant 0 : i32
    %c0_i32_0 = arith.constant 0 : i32
    %c0_i32_1 = arith.constant 0 : i32
    return %c0_i32, %c0_i32_0 : i32, i32
  }
  func.func @transform_3(%arg0: i32) -> (i32, i32) {
    %c0_i32 = arith.constant 0 : i32
    %c0_i32_0 = arith.constant 0 : i32
    %c0_i32_1 = arith.constant 0 : i32
    return %c0_i32, %c0_i32_0 : i32, i32
  }
  func.func @transform_4(%arg0: i32) -> (i32, i32) {
    %c0_i32 = arith.constant 0 : i32
    %c0_i32_0 = arith.constant 0 : i32
    %c0_i32_1 = arith.constant 0 : i32
    return %c0_i32, %c0_i32_0 : i32, i32
  }
  func.func @transform_5(%arg0: i32) -> (i32, i32) {
    %c0_i32 = arith.constant 0 : i32
    %c0_i32_0 = arith.constant 0 : i32
    %c0_i32_1 = arith.constant 0 : i32
    return %c0_i32, %c0_i32_0 : i32, i32
  }
  func.func @transform_6(%arg0: i32) -> (i32, i32) {
    %c0_i32 = arith.constant 0 : i32
    %c0_i32_0 = arith.constant 0 : i32
    %c0_i32_1 = arith.constant 0 : i32
    return %c0_i32, %c0_i32_0 : i32, i32
  }
  func.func @transform_7(%arg0: i32) -> (i32, i32) {
    %c0_i32 = arith.constant 0 : i32
    %c0_i32_0 = arith.constant 0 : i32
    %c0_i32_1 = arith.constant 0 : i32
    return %c0_i32, %c0_i32_0 : i32, i32
  }
  func.func @transform_8(%arg0: i32) -> (i32, i32) {
    %c0_i32 = arith.constant 0 : i32
    %c0_i32_0 = arith.constant 0 : i32
    return %arg0, %c0_i32 : i32, i32
  }
}

</mosaic_0001>

<bundles_post_ra>
// kernel: tpu_custom_call.1
= control target key start
LH: loop header
LB: loop body
LE: loop exit
PB: predicated region body
PF: predicated region fallthrough
CT: control target
= control target key end

     0   :  { %13 = vsyncpa [#allocation3], 0  ;;  %s1618_s0 = inlined_call_operand.hbm [shape: bf16[8,24], index: 0, kind: input, shape index: {}]   ;;  %s1619_s1 = inlined_call_operand.hbm [shape: bf16[8,8], index: 1, kind: input, shape index: {}]   ;;  %s1620_s2 = inlined_call_operand.hbm [shape: bf16[24,512], index: 2, kind: input, shape index: {}]   ;;  %s1621_s3 = inlined_call_operand.hbm [shape: bf16[8,512], index: 3, kind: input, shape index: {}]   ;;  %s1622_s4 = inlined_call_operand.hbm [shape: bf16[512,256], index: 4, kind: input, shape index: {}]   ;;  %s1623_s5 = inlined_call_operand.hbm [shape: bf16[256,128], index: 5, kind: input, shape index: {}]   ;;  %s1624_s6 = inlined_call_operand.vmem [shape: bf16[1,128], index: 6, kind: input, shape index: {}]   ;;  %s1625_s7 = inlined_call_operand.vmem [shape: f32[1,1024], index: 7, kind: input, shape index: {}]   ;;  %s1626_s8 = inlined_call_operand.hbm [shape: f32[8,128], index: 8, kind: output, shape index: {}]  }
   0x1   :  { %14 = vsyncpa [#allocation6], 0 }
   0x2   :  { %15 = vsyncpa [#allocation9], 0 }
   0x3   :  { %16 = vsyncpa [#allocation12], 0 }
   0x4   :  { %17 = vsyncpa [#allocation4], 0  ;;  %s1496_s27 = smov [#allocation5]   ;;  %s1497_s29 = smov [#allocation8]  }
   0x5   :  { %s34_s28 = sshll.u32 %s1496_s27, 4  ;;  %s56_s30 = sshll.u32 %s1497_s29, 4  ;;  %s35_s28 = int_to_ptr.vmem [resolvable:$true] %s34_s28  ;;  %s57_s30 = int_to_ptr.vmem [resolvable:$true] %s56_s30 }
   0x6   :  { %s1354_s9 = scalar_lea.vmem %s35_s28, 64  ;;  %p1359_p1 = scmp.lt.s32.totalorder %s35_s28, %s35_s28 }
   0x7   :  { %p1355_p0 = scmp.ne.s32.totalorder %s35_s28, %s1354_s9  ;;  %p1360_p2 = scmp.lt.s32.totalorder %s1354_s9, %s1354_s9 }
   0x9   :  { %p1361_p3 = por %p1360_p2, %p1359_p1 }
   0xb   :  { %p1362_p4 = pnand %p1361_p3, %p1355_p0 }
   0xd   :  { %1365 = shalt.err (!%p1362_p4)
}
   0xe   :  { %37 = dma.hbm_to_vmem [thread:$0]  %s1619_s1, 64, %s35_s28, [#allocation6]  }
   0xf   :  { %s1374_s12 = scalar_lea.vmem %s57_s30, 256  ;;  %p1379_p6 = scmp.lt.s32.totalorder %s57_s30, %s57_s30 }
  0x10   :  { %p1375_p5 = scmp.ne.s32.totalorder %s57_s30, %s1374_s12  ;;  %p1380_p7 = scmp.lt.s32.totalorder %s1374_s12, %s1374_s12 }
  0x12   :  { %p1381_p8 = por %p1380_p7, %p1379_p6 }
  0x14   :  { %p1382_p9 = pnand %p1381_p8, %p1375_p5 }
  0x16   :  { %1385 = shalt.err (!%p1382_p9)
}
  0x17   :  { %59 = dma.hbm_to_vmem [thread:$0]  %s1621_s3, 256, %s57_s30, [#allocation9]  }
  0x18   :  { %s1498_s15 = smov [#allocation2]   ;;  %s1499_s17 = smov [#allocation7]  }
  0x19   :  { %s24_s16 = sshll.u32 %s1498_s15, 4  ;;  %s43_s18 = sshll.u32 %s1499_s17, 4  ;;  %s25_s16 = int_to_ptr.vmem [resolvable:$true] %s24_s16  ;;  %s44_s18 = int_to_ptr.vmem [resolvable:$true] %s43_s18 }
  0x1a   :  { %s1394_s19 = scalar_lea.vmem %s25_s16, 64  ;;  %p1399_p11 = scmp.lt.s32.totalorder %s25_s16, %s25_s16 }
  0x1b   :  { %p1395_p10 = scmp.ne.s32.totalorder %s25_s16, %s1394_s19  ;;  %p1400_p12 = scmp.lt.s32.totalorder %s1394_s19, %s1394_s19 }
  0x1d   :  { %p1401_p13 = por %p1400_p12, %p1399_p11 }
  0x1f   :  { %p1402_p0 = pnand %p1401_p13, %p1395_p10 }
  0x21   :  { %1405 = shalt.err (!%p1402_p0)
}
  0x22   :  { %27 = dma.hbm_to_vmem [thread:$0]  %s1618_s0, 64, %s25_s16, [#allocation3]  }
  0x23   :  { %s1414_s21 = scalar_lea.vmem %s44_s18, 768  ;;  %p1419_p2 = scmp.lt.s32.totalorder %s44_s18, %s44_s18 }
  0x24   :  { %p1415_p1 = scmp.ne.s32.totalorder %s44_s18, %s1414_s21  ;;  %p1420_p3 = scmp.lt.s32.totalorder %s1414_s21, %s1414_s21 }
  0x26   :  { %p1421_p4 = por %p1420_p3, %p1419_p2 }
  0x28   :  { %p1422_p5 = pnand %p1421_p4, %p1415_p1 }
  0x2a   :  { %1425 = shalt.err (!%p1422_p5)
}
  0x2b   :  { %s1500_s3 = smov 256   ;;  %s1501_s22 = smov 16  }
  0x2c   :  { %49 = dma.hbm_to_vmem [thread:$0]  %s1620_s2, 768, %s44_s18, [#allocation6], %s1500_s3, %s1500_s3, %s1501_s22  }
  0x2d   :  { %s1502_s25 = smov [#allocation10]  }
  0x2e   :  { %s65_s26 = sshll.u32 %s1502_s25, 4  ;;  %s66_s26 = int_to_ptr.vmem [resolvable:$true] %s65_s26 }
  0x2f   :  { %s1434_s27 = scalar_lea.vmem %s66_s26, 8192  ;;  %p1439_p7 = scmp.lt.s32.totalorder %s66_s26, %s66_s26 }
  0x30   :  { %p1435_p6 = scmp.ne.s32.totalorder %s66_s26, %s1434_s27  ;;  %p1440_p8 = scmp.lt.s32.totalorder %s1434_s27, %s1434_s27 }
  0x32   :  { %p1441_p9 = por %p1440_p8, %p1439_p7 }
  0x34   :  { %p1442_p10 = pnand %p1441_p9, %p1435_p6 }
  0x36   :  { %1445 = shalt.err (!%p1442_p10)
}
  0x37   :  { %s1503_s0 = smov 128   ;;  %s1504_s28 = smov 8  }
  0x38   :  { %71 = dma.hbm_to_vmem [thread:$0]  %s1622_s4, 8192, %s66_s26, [#allocation9], %s1503_s0, %s1503_s0, %s1504_s28  }
  0x39   :  { %s1505_s9 = smov [#allocation11]  }
  0x3a   :  { %s77_s10 = sshll.u32 %s1505_s9, 4  ;;  %s78_s10 = int_to_ptr.vmem [resolvable:$true] %s77_s10 }
  0x3b   :  { %s1454_s2 = scalar_lea.vmem %s78_s10, 2048  ;;  %p1459_p12 = scmp.lt.s32.totalorder %s78_s10, %s78_s10 }
  0x3c   :  { %p1455_p11 = scmp.ne.s32.totalorder %s78_s10, %s1454_s2  ;;  %p1460_p13 = scmp.lt.s32.totalorder %s1454_s2, %s1454_s2 }
  0x3e   :  { %p1461_p0 = por %p1460_p13, %p1459_p12 }
  0x40   :  { %p1462_p1 = pnand %p1461_p0, %p1455_p11 }
  0x42   :  { %1465 = shalt.err (!%p1462_p1)
}
  0x43   :  { %s1506_s11 = smov 64   ;;  %s1507_s12 = smov 4  }
  0x44   :  { %83 = dma.hbm_to_vmem [thread:$0]  %s1623_s5, 2048, %s78_s10, [#allocation12], %s1506_s11, %s1506_s11, %s1507_s12  }
  0x45   :  { %1486 = dma.done.wait [#allocation3], 64  }
  0x46   :  { %1487 = vsyncadd [#allocation3], 4294967232 }
  0x47   :  { %1488 = dma.done.wait [#allocation6], 832  }
  0x48   :  { %1489 = vsyncadd [#allocation6], 4294966464 }
  0x49   :  { %1490 = dma.done.wait [#allocation9], 8448  }
  0x4a   :  { %1491 = vsyncadd [#allocation9], 4294958848 }
  0x4b   :  { %1492 = dma.done.wait [#allocation12], 2048  }
  0x4c   :  { %1493 = vsyncadd [#allocation12], 4294965248  ;;  %v1508_v0 = vmov 0   ;;  %v119_v1 = vld [vmem:[#allocation8] sm:$0xff]  ;;  %vm135_vm0 = vcmask 1043456   ;;  %v120_v2 = vld [vmem:[#allocation8 + $0x8] sm:$0xff] }
  0x4d   :  { %180 = vmatprep.mubr.bf16.mxu1 %v1508_v0  ;;  %v1083_v3 = vcombine.high %v119_v1, %v119_v1  ;;  %v1082_v4 = vcombine.low %v119_v1, %v119_v1  ;;  %v1085_v5 = vcombine.high %v120_v2, %v120_v2  ;;  %v1084_v6 = vcombine.low %v120_v2, %v120_v2  ;;  %v116_v7 = vld [vmem:[#allocation7 + $0x20] sm:$0xff]  ;;  %v118_v9 = vld [vmem:[#allocation5] sm:$0xf]  ;;  %v1236_v13 = vld [vmem:[#allocation10 + $0x70] ss:$8 sps:$4 sm:$0xff]  }
  0x4e   :  { %vm131_vm1 = vcmask 64512   ;;  %v1095_v11 = vcombine.high %v116_v7, %v116_v7  ;;  %v1234_v12 = vld [vmem:[#allocation10 + $0x74] ss:$8 sps:$4 sm:$0xff]   ;;  %v1237_v14 = vld [vmem:[#allocation10 + $0x64] ss:$8 sps:$4 sm:$0xff]   ;;  %v1094_v15 = vcombine.low %v116_v7, %v116_v7  ;;  %vm260_vm2 = vcmask 195584  }
  0x4f   :  { %1086 = vmatprep.subr.msk.bf16.mxu1 %vm135_vm0, %v1083_v3  ;;  %v137_v8 = vsel %vm135_vm0, %v1082_v4, 0  ;;  %v143_v10 = vsel %vm135_vm0, %v1084_v6, 0  ;;  %786 = vmatprep.subr.bf16.mxu0 %v1234_v12  ;;  %v1239_v16 = vld [vmem:[#allocation10 + $0x60] ss:$8 sps:$4 sm:$0xff]   ;;  %v1240_v17 = vld [vmem:[#allocation10 + $0x54] ss:$8 sps:$4 sm:$0xff]  }
  0x50   :  { %163 = vmatpush1.bf16.msra.mxu1 %v137_v8  ;;  %787 = vmatpush1.bf16.msra.mxu0 %v1236_v13  ;;  %v1228_v18 = vld [vmem:[#allocation7 + $0x4] ss:$16 sps:$4 sm:$0xff]   ;;  %v265_v19 = vsel %vm135_vm0, %v1094_v15, 0  ;;  %v1245_v20 = vld [vmem:[#allocation10 + $0x50] ss:$8 sps:$4 sm:$0xff]   ;;  %v117_v21 = vld [vmem:[#allocation7 + $0x28] sm:$0xff] }
  0x51   :  { %1088 = vmatprep.subr.msk.bf16.mxu1 %vm135_vm0, %v1085_v5  ;;  %788 = vmatprep.subr.bf16.mxu0 %v1237_v14  ;;  %v1246_v22 = vld [vmem:[#allocation10 + $0x44] ss:$8 sps:$4 sm:$0xff]   ;;  %v1226_v23 = vld [vmem:[#allocation7] ss:$16 sps:$4 sm:$0xff]   ;;  %v1097_v24 = vcombine.high %v117_v21, %v117_v21  ;;  %v1096_v25 = vcombine.low %v117_v21, %v117_v21  ;;  %v1252_v27 = vld [vmem:[#allocation10 + $0x34] ss:$8 sps:$4 sm:$0xff]  }
  0x52   :  { %v1251_v26 = vld [vmem:[#allocation10 + $0x40] ss:$8 sps:$4 sm:$0xff]   ;;  %v111_v28 = vld [vmem:[#allocation2] sm:$0xf]  ;;  %v1233_v29 = vld [vmem:[#allocation7 + $0xc] ss:$16 sps:$4 sm:$0xff]  }
  0x53   :  { %1087 = vmatmul.mubr.msk.bf16.vlgmr.msra.gmra.mxu1 %vm131_vm1, %v118_v9  ;;  %v271_v30 = vsel %vm135_vm0, %v1096_v25, 0  ;;  %v1257_v31 = vld [vmem:[#allocation10 + $0x30] ss:$8 sps:$4 sm:$0xff]   ;;  %v1258_v32 = vld [vmem:[#allocation10 + $0x24] ss:$8 sps:$4 sm:$0xff]  }
  0x54   :  { %204 = vmatpush1.bf16.msra.mxu1 %v143_v10  ;;  %221 = vmatprep.mubr.bf16.mxu1 %v1508_v0  ;;  %v1231_v33 = vld [vmem:[#allocation7 + $0x8] ss:$16 sps:$4 sm:$0xff]   ;;  %v1244_v34 = vld [vmem:[#allocation10 + $0x174] ss:$8 sps:$4 sm:$0xff]   ;;  %v1250_v38 = vld [vmem:[#allocation10 + $0x164] ss:$8 sps:$4 sm:$0xff]  }
  0x55   :  { %1098 = vmatprep.subr.msk.bf16.mxu1 %vm135_vm0, %v1095_v11  ;;  %789 = vmatpush1.bf16.msra.mxu0 %v1239_v16  ;;  %v1263_v35 = vld [vmem:[#allocation10 + $0x20] ss:$8 sps:$4 sm:$0xff]   ;;  %v1264_v36 = vld [vmem:[#allocation10 + $0x14] ss:$8 sps:$4 sm:$0xff]   ;;  %v1242_v37 = vld [vmem:[#allocation10 + $0x170] ss:$8 sps:$4 sm:$0xff]  }
  0x56   :  { %790 = vmatprep.subr.bf16.mxu0 %v1240_v17  ;;  %v1269_v39 = vld [vmem:[#allocation10 + $0x10] ss:$8 sps:$4 sm:$0xff]   ;;  %v1270_v40 = vld [vmem:[#allocation10 + $0x4] ss:$8 sps:$4 sm:$0xff]   ;;  %v1248_v41 = vld [vmem:[#allocation10 + $0x160] ss:$8 sps:$4 sm:$0xff]  }
  0x57   :  { %v1256_v42 = vld [vmem:[#allocation10 + $0x154] ss:$8 sps:$4 sm:$0xff]   ;;  %v1275_v43 = vld [vmem:[#allocation10] ss:$8 sps:$4 sm:$0xff]   ;;  %v1254_v45 = vld [vmem:[#allocation10 + $0x150] ss:$8 sps:$4 sm:$0xff]  }
  0x58   :  { %v1276_v44 = vld [vmem:[#allocation10 + $0xf4] ss:$8 sps:$4 sm:$0xff]   ;;  %v1262_v46 = vld [vmem:[#allocation10 + $0x144] ss:$8 sps:$4 sm:$0xff]   ;;  %v1281_v47 = vld [vmem:[#allocation10 + $0xf0] ss:$8 sps:$4 sm:$0xff]  }
  0x59   :  { %791 = vmatpush1.bf16.msra.mxu0 %v1245_v20  ;;  %v1260_v48 = vld [vmem:[#allocation10 + $0x140] ss:$8 sps:$4 sm:$0xff]   ;;  %v1268_v49 = vld [vmem:[#allocation10 + $0x134] ss:$8 sps:$4 sm:$0xff]   ;;  %v1266_v50 = vld [vmem:[#allocation10 + $0x130] ss:$8 sps:$4 sm:$0xff]  }
  0x5a   :  { %792 = vmatprep.subr.bf16.mxu0 %v1246_v22  ;;  %v1274_v51 = vld [vmem:[#allocation10 + $0x124] ss:$8 sps:$4 sm:$0xff]   ;;  %v1272_v52 = vld [vmem:[#allocation10 + $0x120] ss:$8 sps:$4 sm:$0xff]   ;;  %v1280_v53 = vld [vmem:[#allocation10 + $0x114] ss:$8 sps:$4 sm:$0xff]  }
  0x5b   :  { %1089 = vmatmul.mubr.msk.bf16.vlgmr.msra.gmra.mxu1 %vm131_vm1, %v118_v9  ;;  %v1278_v54 = vld [vmem:[#allocation10 + $0x110] ss:$8 sps:$4 sm:$0xff]   ;;  %v1282_v55 = vld [vmem:[#allocation10 + $0xe4] ss:$8 sps:$4 sm:$0xff]   ;;  %v1284_v57 = vld [vmem:[#allocation10 + $0x100] ss:$8 sps:$4 sm:$0xff]  }
  0x5c   :  { %289 = vmatpush1.bf16.msra.mxu1 %v265_v19  ;;  %308 = vmatprep.mubr.bf16.mxu1 %v1508_v0  ;;  %v1286_v56 = vld [vmem:[#allocation10 + $0x104] ss:$8 sps:$4 sm:$0xff]   ;;  %v1287_v58 = vld [vmem:[#allocation10 + $0xe0] ss:$8 sps:$4 sm:$0xff]   ;;  %v1288_v59 = vld [vmem:[#allocation10 + $0xd4] ss:$8 sps:$4 sm:$0xff]  }
  0x5d   :  { %290 = vmatprep.subr.bf16.mxu1 %v1228_v18  ;;  %793 = vmatpush1.bf16.msra.mxu0 %v1251_v26  ;;  %v1292_v60 = vld [vmem:[#allocation10 + $0x1f4] ss:$8 sps:$4 sm:$0xff]   ;;  %v1290_v61 = vld [vmem:[#allocation10 + $0x1f0] ss:$8 sps:$4 sm:$0xff]   ;;  %v1294_v63 = vld [vmem:[#allocation10 + $0xc4] ss:$8 sps:$4 sm:$0xff]   ;;  %v359_v26 = vlaneseq }
  0x5e   :  { %794 = vmatprep.subr.bf16.mxu0 %v1252_v27  ;;  %v1293_v62 = vld [vmem:[#allocation10 + $0xd0] ss:$8 sps:$4 sm:$0xff]   ;;  %v1296_v1 = vld [vmem:[#allocation10 + $0x1e0] ss:$8 sps:$4 sm:$0xff]   ;;  %v1300_v3 = vld [vmem:[#allocation10 + $0xb4] ss:$8 sps:$4 sm:$0xff]  }
  0x5f   :  { %v1299_v2 = vld [vmem:[#allocation10 + $0xc0] ss:$8 sps:$4 sm:$0xff]   ;;  %v1304_v4 = vld [vmem:[#allocation10 + $0x1d4] ss:$8 sps:$4 sm:$0xff]   ;;  %v1302_v5 = vld [vmem:[#allocation10 + $0x1d0] ss:$8 sps:$4 sm:$0xff]  }
  0x60   :  { %291 = vmatpush1.bf16.msra.mxu1 %v1226_v23  ;;  %v1305_v6 = vld [vmem:[#allocation10 + $0xb0] ss:$8 sps:$4 sm:$0xff]   ;;  %v1306_v7 = vld [vmem:[#allocation10 + $0xa4] ss:$8 sps:$4 sm:$0xff]   ;;  %v1308_v9 = vld [vmem:[#allocation10 + $0x1c0] ss:$8 sps:$4 sm:$0xff]  }
  0x61   :  { %1100 = vmatprep.subr.msk.bf16.mxu1 %vm135_vm0, %v1097_v24  ;;  %795 = vmatpush1.bf16.msra.mxu0 %v1257_v31  ;;  %v1310_v8 = vld [vmem:[#allocation10 + $0x1c4] ss:$8 sps:$4 sm:$0xff]   ;;  %v1311_v10 = vld [vmem:[#allocation10 + $0xa0] ss:$8 sps:$4 sm:$0xff]   ;;  %v1312_v11 = vld [vmem:[#allocation10 + $0x94] ss:$8 sps:$4 sm:$0xff]  }
  0x62   :  { %796 = vmatprep.subr.bf16.mxu0 %v1258_v32  ;;  %v1316_v12 = vld [vmem:[#allocation10 + $0x1b4] ss:$8 sps:$4 sm:$0xff]   ;;  %v1314_v13 = vld [vmem:[#allocation10 + $0x1b0] ss:$8 sps:$4 sm:$0xff]   ;;  %v1318_v15 = vld [vmem:[#allocation10 + $0x84] ss:$8 sps:$4 sm:$0xff]  }
  0x63   :  { %1099 = vmatmul.mubr.msk.bf16.vlgmr.msra.gmra.mxu1 %vm260_vm2, %v111_v28  ;;  %v1317_v14 = vld [vmem:[#allocation10 + $0x90] ss:$8 sps:$4 sm:$0xff]   ;;  %v1322_v16 = vld [vmem:[#allocation10 + $0x1a4] ss:$8 sps:$4 sm:$0xff]   ;;  %v1320_v17 = vld [vmem:[#allocation10 + $0x1a0] ss:$8 sps:$4 sm:$0xff]  }
  0x64   :  { %330 = vmatpush1.bf16.msra.mxu1 %v271_v30  ;;  %349 = vmatprep.mubr.bf16.mxu1 %v1508_v0  ;;  %v1298_v0 = vld [vmem:[#allocation10 + $0x1e4] ss:$8 sps:$4 sm:$0xff]   ;;  %v1323_v18 = vld [vmem:[#allocation10 + $0x80] ss:$8 sps:$4 sm:$0xff]   ;;  %v1326_v19 = vld [vmem:[#allocation10 + $0x194] ss:$8 sps:$4 sm:$0xff]  }
  0x65   :  { %331 = vmatprep.subr.bf16.mxu1 %v1233_v29  ;;  %797 = vmatpush1.bf16.msra.mxu0 %v1263_v35  ;;  %v1324_v20 = vld [vmem:[#allocation10 + $0x190] ss:$8 sps:$4 sm:$0xff]   ;;  %v1329_v21 = vld [vmem:[#allocation10 + $0x184] ss:$8 sps:$4 sm:$0xff]   ;;  %v1327_v22 = vld [vmem:[#allocation10 + $0x180] ss:$8 sps:$4 sm:$0xff]  }
  0x66   :  { %798 = vmatprep.subr.bf16.mxu0 %v1264_v36  ;;  %v1330_v23 = vld [vmem:[#allocation11 + $0x78] sm:$0xff]   ;;  %v1585_v29 = vshrl.u32 %v359_v26, 7 }
  0x68   :  { %332 = vmatpush1.bf16.msra.mxu1 %v1231_v33  ;;  %v1588_v32 = vsub.s32 0, %v1585_v29  ;;  %v365_v35 = vsub.s32 1, %v1585_v29 }
  0x69   :  { %827 = vmatprep.subr.bf16.mxu1 %v1244_v34  ;;  %799 = vmatpush1.bf16.msra.mxu0 %v1269_v39  ;;  %v107_v34 = vld [vmem:[%s1625_s7] sm:$0xf] }
  0x6a   :  { %800 = vmatprep.subr.bf16.mxu0 %v1270_v40  ;;  %v366_v40 = vrot.slane %v107_v34, %v365_v35 }
  0x6b   :  { %1101 = vmatmul.mubr.msk.bf16.vlgmr.msra.gmra.mxu1 %vm260_vm2, %v111_v28 }
  0x6c   :  { %828 = vmatpush1.bf16.msra.mxu1 %v1242_v37  ;;  %v362_v37 = vrot.slane %v107_v34, %v1588_v32 }
  0x6d   :  { %829 = vmatprep.subr.bf16.mxu1 %v1250_v38  ;;  %801 = vmatpush1.bf16.msra.mxu0 %v1275_v43 }
  0x6e   :  { %802 = vmatprep.subr.bf16.mxu0 %v1276_v44  ;;  %v369_v44 = vsub.s32 2, %v1585_v29 }
  0x70   :  { %830 = vmatpush1.bf16.msra.mxu1 %v1248_v41 }
  0x71   :  { %831 = vmatprep.subr.bf16.mxu1 %v1256_v42  ;;  %803 = vmatpush2.bf16.msra.mxu0 %v1281_v47 }
  0x72   :  { %804 = vmatprep.subr.bf16.mxu0 %v1282_v55 }
  0x74   :  { %832 = vmatpush1.bf16.msra.mxu1 %v1254_v45 }
  0x75   :  { %833 = vmatprep.subr.bf16.mxu1 %v1262_v46  ;;  %805 = vmatpush2.bf16.msra.mxu0 %v1287_v58  ;;  %v373_v46 = vsub.s32 3, %v1585_v29  ;;  %v1047_v29 = vld [vmem:[%s1624_s6] sm:$0x1]  ;;  %s1509_s6 = smov [#allocation13]  }
  0x76   :  { %806 = vmatprep.subr.bf16.mxu0 %v1288_v59  ;;  %v1332_v59 = vld [vmem:[#allocation11 + $0x70] sm:$0xff]   ;;  %s1070_s3 = sshll.u32 %s1509_s6, 4  ;;  %s1071_s3 = int_to_ptr.vmem [resolvable:$true] %s1070_s3 }
  0x77   :  { %s1466_s22 = scalar_lea.vmem %s1071_s3, 128  ;;  %p1471_p3 = scmp.lt.s32.totalorder %s1071_s3, %s1071_s3 }
  0x78   :  { %834 = vmatpush1.bf16.msra.mxu1 %v1260_v48  ;;  %p1467_p2 = scmp.ne.s32.totalorder %s1071_s3, %s1466_s22  ;;  %p1472_p4 = scmp.lt.s32.totalorder %s1466_s22, %s1466_s22 }
  0x79   :  { %835 = vmatprep.subr.bf16.mxu1 %v1268_v49  ;;  %807 = vmatpush2.bf16.msra.mxu0 %v1293_v62 }
  0x7a   :  { %808 = vmatprep.subr.bf16.mxu0 %v1294_v63  ;;  %p1473_p5 = por %p1472_p4, %p1471_p3 }
  0x7c   :  { %836 = vmatpush1.bf16.msra.mxu1 %v1266_v50  ;;  %v370_v50 = vrot.slane %v107_v34, %v369_v44  ;;  %p1474_p6 = pnand %p1473_p5, %p1467_p2 }
  0x7d   :  { %837 = vmatprep.subr.bf16.mxu1 %v1274_v51  ;;  %809 = vmatpush2.bf16.msra.mxu0 %v1299_v2 }
  0x7e   :  { %810 = vmatprep.subr.bf16.mxu0 %v1300_v3  ;;  %v1334_v3 = vld [vmem:[#allocation11 + $0x68] sm:$0xff]  }
  0x80   :  { %838 = vmatpush1.bf16.msra.mxu1 %v1272_v52 }
  0x81   :  { %839 = vmatprep.subr.bf16.mxu1 %v1280_v53  ;;  %811 = vmatpush2.bf16.msra.mxu0 %v1305_v6  ;;  %v1335_v6 = vld [vmem:[#allocation11 + $0x28] sm:$0xff]  }
  0x82   :  { %812 = vmatprep.subr.bf16.mxu0 %v1306_v7 }
  0x84   :  { %840 = vmatpush1.bf16.msra.mxu1 %v1278_v54  ;;  %v374_v54 = vrot.slane %v107_v34, %v373_v46 }
  0x85   :  { %841 = vmatprep.subr.bf16.mxu1 %v1286_v56  ;;  %813 = vmatpush2.bf16.msra.mxu0 %v1311_v10  ;;  %v1331_v56 = vld [vmem:[#allocation11 + $0x38] sm:$0xff]  }
  0x86   :  { %814 = vmatprep.subr.bf16.mxu0 %v1312_v11  ;;  %v1338_v10 = vld [vmem:[#allocation11 + $0x58] sm:$0xff]  }
  0x87   :  { %v1339_v11 = vld [vmem:[#allocation11 + $0x18] sm:$0xff]  }
  0x88   :  { %842 = vmatpush1.bf16.msra.mxu1 %v1284_v57 }
  0x89   :  { %843 = vmatprep.subr.bf16.mxu1 %v1292_v60  ;;  %815 = vmatpush2.bf16.msra.mxu0 %v1317_v14  ;;  %v1342_v14 = vld [vmem:[#allocation11 + $0x48] sm:$0xff]  }
  0x8a   :  { %816 = vmatprep.subr.bf16.mxu0 %v1318_v15  ;;  %v1343_v15 = vld [vmem:[#allocation11 + $0x8] sm:$0xff]  }
  0x8c   :  { %844 = vmatpush2.bf16.msra.mxu1 %v1290_v61 }
  0x8d   :  { %845 = vmatprep.subr.bf16.mxu1 %v1298_v0  ;;  %817 = vmatpush2.bf16.msra.mxu0 %v1323_v18  ;;  %v1333_v0 = vld [vmem:[#allocation11 + $0x30] sm:$0xff]   ;;  %v108_v18 = vld [vmem:[%s1625_s7 + $0x4] sm:$0x3] }
  0x8e   :  { %1184 = vmatprep.subr.bf16.mxu0 %v1330_v23  ;;  %v463_v23 = vrot.slane %v108_v18, %v365_v35 }
  0x90   :  { %846 = vmatpush2.bf16.msra.mxu1 %v1296_v1 }
  0x91   :  { %847 = vmatprep.subr.bf16.mxu1 %v1304_v4 }
  0x94   :  { %848 = vmatpush2.bf16.msra.mxu1 %v1302_v5 }
  0x95   :  { %849 = vmatprep.subr.bf16.mxu1 %v1310_v8  ;;  %v1336_v8 = vld [vmem:[#allocation11 + $0x60] sm:$0xff]  }
  0x98   :  { %850 = vmatpush2.bf16.msra.mxu1 %v1308_v9  ;;  %v1337_v9 = vld [vmem:[#allocation11 + $0x20] sm:$0xff]  }
  0x99   :  { %851 = vmatprep.subr.bf16.mxu1 %v1316_v12  ;;  %v1340_v12 = vld [vmem:[#allocation11 + $0x50] sm:$0xff]  }
  0x9c   :  { %852 = vmatpush2.bf16.msra.mxu1 %v1314_v13  ;;  %v1341_v13 = vld [vmem:[#allocation11 + $0x10] sm:$0xff]  }
  0x9d   :  { %853 = vmatprep.subr.bf16.mxu1 %v1322_v16  ;;  %v1344_v16 = vld [vmem:[#allocation11 + $0x40] sm:$0xff]  }
  0xa0   :  { %854 = vmatpush2.bf16.msra.mxu1 %v1320_v17  ;;  %v1345_v17 = vld [vmem:[#allocation11] sm:$0xff]  }
  0xa1   :  { %855 = vmatprep.subr.bf16.mxu1 %v1326_v19 }
  0xa4   :  { %856 = vmatpush2.bf16.msra.mxu1 %v1324_v20 }
  0xa5   :  { %857 = vmatprep.subr.bf16.mxu1 %v1329_v21  ;;  %v459_v21 = vrot.slane %v108_v18, %v1588_v32 }
  0xa8   :  { %858 = vmatpush2.bf16.msra.mxu1 %v1327_v22 }
 0x113   :  { %v182_v24 = vpop.f32.mrf.mxu1 }
 0x115   :  { %v184_v25 = vpop.f32.mrf.mxu1 }
 0x117   :  { %v186_v27 = vpop.f32.mrf.mxu1 }
 0x119   :  { %v187_v28 = vpop.f32.mrf.mxu1 }
 0x11b   :  { %v223_v30 = vpop.f32.mrf.mxu1 }
 0x11d   :  { %v225_v31 = vpop.f32.mrf.mxu1 }
 0x11f   :  { %v227_v33 = vpop.f32.mrf.mxu1 }
 0x121   :  { %v228_v36 = vpop.f32.mrf.mxu1 }
 0x123   :  { %v310_v38 = vpop.f32.mrf.mxu1 }
 0x124   :  { %v311_v39 = vadd.f32 %v310_v38, %v182_v24 }
 0x125   :  { %v312_v41 = vpop.f32.mrf.mxu1 }
 0x126   :  { %v379_v42 = vadd.f32 %v362_v37, %v311_v39  ;;  %v313_v43 = vadd.f32 %v312_v41, %v184_v25 }
 0x127   :  { %v314_v45 = vpop.f32.mrf.mxu1 }
 0x128   :  { %v380_v47 = vadd.f32 %v366_v40, %v313_v43  ;;  %v383_v48 = vmax.f32 %v379_v42, 0.0  ;;  %v1048_v40 = vunpack.c.l.bf16 %v1047_v29  ;;  %v1166_v42 = vld [vmem:[%s1625_s7 + $0x6] ss:$0 sm:$0xff] }
 0x129   :  { %v315_v49 = vpop.f32.mrf.mxu1 }
 0x12a   :  { %v384_v51 = vmax.f32 %v380_v47, 0.0  ;;  %v387_v57 = vpack.c.bf16 %v383_v48, %v383_v48  ;;  %v1052_v46 = vrot.slane %v1048_v40, %v1588_v32 }
 0x12b   :  { %v351_v52 = vpop.f32.mrf.mxu1 }
 0x12c   :  { %v352_v53 = vadd.f32 %v351_v52, %v223_v30  ;;  %v388_v55 = vpack.c.bf16 %v384_v51, %v384_v51 }
 0x12d   :  { %v353_v58 = vpop.f32.mrf.mxu1 }
 0x12e   :  { %v381_v60 = vadd.f32 %v370_v50, %v352_v53  ;;  %v354_v61 = vadd.f32 %v353_v58, %v225_v31  ;;  %818 = vmatprep.mubr.bf16.mxu0 %v388_v55  ;;  %v1183_v50 = vld [vmem:[%s1625_s7 + $0x7] ss:$0 sm:$0xff] }
 0x12f   :  { %v355_v62 = vpop.f32.mrf.mxu1  ;;  %819 = vmatmul.mubr.bf16.vlgmr.msra.gmra.mxu0 %v387_v57 }
 0x130   :  { %v382_v63 = vadd.f32 %v374_v54, %v354_v61  ;;  %1185 = vmatpush3.bf16.msra.mxu0 %v1331_v56  ;;  %v385_v1 = vmax.f32 %v381_v60, 0.0 }
 0x131   :  { %v356_v2 = vpop.f32.mrf.mxu1  ;;  %1186 = vmatprep.subr.bf16.mxu0 %v1332_v59 }
 0x132   :  { %v386_v4 = vmax.f32 %v382_v63, 0.0  ;;  %v389_v7 = vpack.c.bf16 %v385_v1, %v385_v1 }
 0x134   :  { %v390_v5 = vpack.c.bf16 %v386_v4, %v386_v4  ;;  %1187 = vmatpush3.bf16.msra.mxu0 %v1333_v0 }
 0x135   :  { %1188 = vmatprep.subr.bf16.mxu0 %v1334_v3 }
 0x136   :  { %859 = vmatprep.mubr.bf16.mxu1 %v390_v5 }
 0x137   :  { %860 = vmatmul.mubr.bf16.vlgmr.msra.gmra.mxu1 %v389_v7 }
 0x138   :  { %1189 = vmatpush3.bf16.msra.mxu0 %v1335_v6 }
 0x139   :  { %1190 = vmatprep.subr.bf16.mxu0 %v1336_v8 }
 0x13c   :  { %1191 = vmatpush3.bf16.msra.mxu0 %v1337_v9 }
 0x13d   :  { %1192 = vmatprep.subr.bf16.mxu0 %v1338_v10 }
 0x140   :  { %1193 = vmatpush3.bf16.msra.mxu0 %v1339_v11 }
 0x141   :  { %1194 = vmatprep.subr.bf16.mxu0 %v1340_v12 }
 0x144   :  { %1195 = vmatpush3.bf16.msra.mxu0 %v1341_v13 }
 0x145   :  { %1196 = vmatprep.subr.bf16.mxu0 %v1342_v14 }
 0x148   :  { %1197 = vmatpush3.bf16.msra.mxu0 %v1343_v15 }
 0x149   :  { %1198 = vmatprep.subr.bf16.mxu0 %v1344_v16 }
 0x14c   :  { %1199 = vmatpush3.bf16.msra.mxu0 %v1345_v17 }
 0x1ef   :  { %v820_v19 = vpop.f32.mrf.mxu0 }
 0x1f0   :  { %v821_v25 = vadd.f32 %v820_v19, %v459_v21 }
 0x1f1   :  { %v822_v20 = vpop.f32.mrf.mxu0 }
 0x1f2   :  { %v823_v27 = vadd.f32 %v822_v20, %v463_v23 }
 0x1f3   :  { %v824_v22 = vpop.f32.mrf.mxu0 }
 0x1f5   :  { %v825_v24 = vpop.f32.mrf.mxu0 }
 0x1f7   :  { %v861_v26 = vpop.f32.mrf.mxu1 }
 0x1f8   :  { %v862_v28 = vadd.f32 %v861_v26, %v821_v25 }
 0x1f9   :  { %v863_v30 = vpop.f32.mrf.mxu1 }
 0x1fa   :  { %v864_v31 = vadd.f32 %v863_v30, %v823_v27  ;;  %v868_v33 = vmax.f32 %v862_v28, 0.0 }
 0x1fb   :  { %v865_v34 = vpop.f32.mrf.mxu1 }
 0x1fc   :  { %v869_v36 = vmax.f32 %v864_v31, 0.0  ;;  %v870_v39 = vpack.c.bf16 %v868_v33, %v868_v33 }
 0x1fd   :  { %v866_v37 = vpop.f32.mrf.mxu1 }
 0x1fe   :  { %v871_v38 = vpack.c.bf16 %v869_v36, %v869_v36 }
 0x200   :  { %1038 = vmatprep.mubr.bf16.mxu0 %v871_v38 }
 0x201   :  { %1039 = vmatmul.mubr.bf16.vlgmr.msra.gmra.mxu0 %v870_v39 }
 0x2c1   :  { %v1200_v35 = vpop.f32.mrf.mxu0 }
 0x2c3   :  { %v1201_v41 = vpop.f32.mrf.mxu0 }
 0x2c4   :  { %v1202_v43 = vadd.f32 %v1201_v41, %v1200_v35 }
 0x2c5   :  { %v1203_v44 = vpop.f32.mrf.mxu0 }
 0x2c6   :  { %v1041_v45 = vadd.f32 %v1202_v43, %v1166_v42 }
 0x2c7   :  { %v1204_v47 = vpop.f32.mrf.mxu0 }
 0x2c8   :  { %v1046_v48 = vmax.f32 %v1041_v45, 0.0 }
 0x2ca   :  { %v1053_v49 = vmul.f32 %v1052_v46, %v1046_v48 }
 0x2cc   :  { %1054 = vadd.xlane.f32.xlu0 %v1053_v49 }
 0x355   :  { %v1055_v51 = vpop.xlane.xlu0 %1054 }
 0x356   :  { %v1062_v52 = vadd.f32 %v1183_v50, %v1055_v51 }
 0x358   :  { %1063 = vst [vmem:[#allocation13] sm:$0xff] %v1062_v52 }
 0x359   :  { %1477 = shalt.err (!%p1474_p6)
}
 0x35a   :  { %1073 = dma.vmem_to_hbm [thread:$0]  %s1071_s3, 128, %s1626_s8, [#allocation4]  }
 0x35b   :  { %1494 = dma.done.wait [#allocation4], 128  }
 0x35c   :  { %1495 = vsyncadd [#allocation4], 4294967168 }
 0x35d   :  { %1077 = vsyncpa [#allocation3], 1 }
 0x35e   :  { %1078 = vsyncpa [#allocation6], 1 }
 0x35f   :  { %1079 = vsyncpa [#allocation9], 1 }
 0x360   :  { %1080 = vsyncpa [#allocation12], 1 }
 0x361   :  { %1081 = vsyncpa [#allocation4], 1 }

</bundles_post_ra>
